<compile_context>
chip_gen: v6e
topology: v6e:2x2x1
jax: 0.10.0
libtpu: 0.0.40
codegen_flags: <defaults>
</compile_context>

<pallas_src>
import functools

import jax
import jax.numpy as jnp
from jax.experimental import pallas as pl
from jax.experimental.pallas import tpu as pltpu

MAX_TILE_B = 2048   # rows per grid step; ~1 MiB of f32 activations per buffer


def _round_up(n, m):
    return ((n + m - 1) // m) * m


def _batch_tiling(batch):
    """Pick rows-per-grid-step and the grid size."""
    b8 = _round_up(max(batch, 1), 8)
    # Aim for >= 2 grid steps so dimension_semantics=("parallel",) can shard
    # across both TensorCores on v7x whenever there is enough work.
    two_way = _round_up(pl.cdiv(b8, 2), 8)
    tile_b = min(MAX_TILE_B, two_way, b8)
    grid = pl.cdiv(batch, tile_b)            # ragged last block is masked
    return tile_b, grid


def _vmem_limit_bytes(tile_b, f_in, hidden, f_out, itemsize):
    """Scoped-VMEM budget derived from the actual tiles (+ headroom)."""
    buffered = 2 * tile_b * (f_in + f_out) * itemsize          # x/out, 2 bufs
    weights = 2 * (f_in * hidden + hidden * f_out + hidden + f_out) * itemsize
    scratch = tile_b * hidden * 4                              # f32 intermediate
    need = buffered + weights + scratch
    return int(min(48 << 20, max(4 << 20, 2 * need + (2 << 20))))


# ----------------------------- Pallas kernels ------------------------------ #
def _fused_mlp2_kernel(x_ref, w1_ref, b1_ref, w2_ref, b2_ref, o_ref):
    # o = relu(relu(x @ W1 + b1) @ W2 + b2); the (tile_b, 64) intermediate
    # never leaves VMEM/vregs.
    x = x_ref[...]
    y1 = jnp.dot(x, w1_ref[...], preferred_element_type=jnp.float32)
    y1 = jnp.maximum(y1 + b1_ref[...], 0.0)
    # cast back to the input dtype before the second dot (no-op for f32,
    # MXU-friendly for bf16 inputs)
    y2 = jnp.dot(y1.astype(x.dtype), w2_ref[...],
                 preferred_element_type=jnp.float32)
    y2 = jnp.maximum(y2 + b2_ref[...], 0.0)
    o_ref[...] = y2.astype(o_ref.dtype)


def _linear_relu_kernel(x_ref, w_ref, b_ref, o_ref):
    y = jnp.dot(x_ref[...], w_ref[...], preferred_element_type=jnp.float32)
    o_ref[...] = jnp.maximum(y + b_ref[...], 0.0).astype(o_ref.dtype)


# ------------------------------ wrappers ----------------------------------- #
def _fused_call(x, w1, b1, w2, b2):
    batch, f_in = x.shape
    hidden = w1.shape[1]
    f_out = w2.shape[1]
    tile_b, grid = _batch_tiling(batch)
    itemsize = jnp.dtype(x.dtype).itemsize

    cost = pl.CostEstimate(
        flops=2 * batch * (f_in * hidden + hidden * f_out),
        transcendentals=0,
        bytes_accessed=(batch * (f_in + f_out)
                        + f_in * hidden + hidden * f_out
                        + hidden + f_out) * itemsize,
    )

    return pl.pallas_call(
        _fused_mlp2_kernel,
        out_shape=jax.ShapeDtypeStruct((batch, f_out), x.dtype),
        grid=(grid,),
        in_specs=[
            pl.BlockSpec((tile_b, f_in), lambda i: (i, 0)),   # activations
            pl.BlockSpec((f_in, hidden), lambda i: (0, 0)),   # W1 (resident)
            pl.BlockSpec((1, hidden), lambda i: (0, 0)),      # b1
            pl.BlockSpec((hidden, f_out), lambda i: (0, 0)),  # W2 (resident)
            pl.BlockSpec((1, f_out), lambda i: (0, 0)),       # b2
        ],
        out_specs=pl.BlockSpec((tile_b, f_out), lambda i: (i, 0)),
        compiler_params=pltpu.CompilerParams(
            dimension_semantics=("parallel",),
            vmem_limit_bytes=_vmem_limit_bytes(tile_b, f_in, hidden, f_out,
                                               itemsize),
        ),
        cost_estimate=cost,
    )(x, w1, b1, w2, b2)


@jax.custom_vjp
def fused_linear_relu_x2(x, w1, b1, w2, b2):
    """relu(relu(x@W1+b1)@W2+b2) as a single Pallas call (custom VJP)."""
    return _fused_call(x, w1, b1, w2, b2)


def _fused_fwd(x, w1, b1, w2, b2):
    return _fused_call(x, w1, b1, w2, b2), (x, w1, b1, w2, b2)


def _fused_bwd(res, g):
    x, w1, b1, w2, b2 = res
    y1 = jnp.maximum(jnp.dot(x, w1) + b1, 0.0).astype(x.dtype)
    y2 = jnp.maximum(jnp.dot(y1, w2) + b2, 0.0)
    g2 = jnp.where(y2 > 0, g, 0.0).astype(x.dtype)
    dw2 = y1.T @ g2
    db2 = g2.sum(axis=0, keepdims=True)
    gy1 = g2 @ w2.T
    g1 = jnp.where(y1 > 0, gy1, 0.0).astype(x.dtype)
    dw1 = x.T @ g1
    db1 = g1.sum(axis=0, keepdims=True)
    dx = g1 @ w1.T
    return dx, dw1, db1, dw2, db2


fused_linear_relu_x2.defvjp(_fused_fwd, _fused_bwd)


def _linear_relu_call(x, w, b):
    batch, f_in = x.shape
    f_out = w.shape[1]
    tile_b, grid = _batch_tiling(batch)
    itemsize = jnp.dtype(x.dtype).itemsize

    cost = pl.CostEstimate(
        flops=2 * batch * f_in * f_out,
        transcendentals=0,
        bytes_accessed=(batch * (f_in + f_out) + f_in * f_out + f_out)
        * itemsize,
    )

    return pl.pallas_call(
        _linear_relu_kernel,
        out_shape=jax.ShapeDtypeStruct((batch, f_out), x.dtype),
        grid=(grid,),
        in_specs=[
            pl.BlockSpec((tile_b, f_in), lambda i: (i, 0)),
            pl.BlockSpec((f_in, f_out), lambda i: (0, 0)),
            pl.BlockSpec((1, f_out), lambda i: (0, 0)),
        ],
        out_specs=pl.BlockSpec((tile_b, f_out), lambda i: (i, 0)),
        compiler_params=pltpu.CompilerParams(
            dimension_semantics=("parallel",),
            vmem_limit_bytes=_vmem_limit_bytes(tile_b, f_in, f_in, f_out,
                                               itemsize),
        ),
        cost_estimate=cost,
    )(x, w, b)


@jax.custom_vjp
def linear_relu(x, w, b):
    """Single fused Linear+ReLU (used for an odd trailing ReLU layer)."""
    return _linear_relu_call(x, w, b)


def _linear_relu_fwd(x, w, b):
    return _linear_relu_call(x, w, b), (x, w, b)


def _linear_relu_bwd(res, g):
    x, w, b = res
    y = jnp.maximum(jnp.dot(x, w) + b, 0.0)
    gz = jnp.where(y > 0, g, 0.0).astype(x.dtype)
    return gz @ w.T, x.T @ gz, gz.sum(axis=0, keepdims=True)


linear_relu.defvjp(_linear_relu_fwd, _linear_relu_bwd)


# ------------------------- wrapped "nn.Sequential" ------------------------- #
def make_sequential_params(key, dims, relu=True):
    """Deterministic init matching nn.Linear shapes: W (in,out), b (1,out)."""
    layers = []
    for fin, fout in zip(dims[:-1], dims[1:]):
        key, kw, kb = jax.random.split(key, 3)
        bound = 1.0 / (fin ** 0.5)
        w = jax.random.uniform(kw, (fin, fout), jnp.float32, -bound, bound)
        b = jax.random.uniform(kb, (1, fout), jnp.float32, -bound, bound)
        layers.append((w, b, relu))
    return layers


def sequential_segment(layers, x):
    """Run a chunk of the sequential.

    `layers` is a list of (W, b, apply_relu).  Consecutive Linear+ReLU pairs
    are fused into one Pallas kernel; a trailing Linear+ReLU uses the single
    fused kernel; a bare Linear (no activation) falls back to plain XLA.
    """
    i, n = 0, len(layers)
    while i < n:
        w, b, act = layers[i]
        if act and i + 1 < n and layers[i + 1][2]:
            w2, b2, _ = layers[i + 1]
            x = fused_linear_relu_x2(x, w, b, w2, b2)
            i += 2
        elif act:
            x = linear_relu(x, w, b)
            i += 1
        else:
            # TODO(synk): bare Linear (no activation) uses plain XLA matmul.
            x = x @ w + b
            i += 1
    return x


class CheckpointModule:
    """JAX analogue of the PyTorch CheckpointModule wrapper.

    forward(x) == module(x); gradient checkpointing is realized with
    jax.checkpoint applied to each of `num_segments` chunks of the sequential
    (recompute-on-backward, identical forward).  No parameter prep lives
    inside the rematted function, so the only backward recompute is the
    fused forward kernel itself.
    """

    def __init__(self, layers, num_segments=1):
        assert num_segments == 1 or len(layers) >= num_segments
        self.layers = layers
        self.num_segments = num_segments

    def __call__(self, x):
        n_layers = len(self.layers)
        if self.num_segments > 1:
            seg_size = -(-n_layers // self.num_segments)  # ceil div
            segments = [self.layers[i:i + seg_size]
                        for i in range(0, n_layers, seg_size)]
        else:
            segments = [self.layers]
        for seg in segments:
            fn = jax.checkpoint(functools.partial(sequential_segment, seg))
            x = fn(x)
        return x


# --------------------------------- main ------------------------------------ #
if __name__ == "__main__":
    key = jax.random.PRNGKey(0)
    k_in, k_params = jax.random.split(key)

    batch, hidden = 8, 32
    dims = (hidden, 64, hidden)  # Linear(32,64)+ReLU, Linear(64,32)+ReLU

    x = jax.random.normal(k_in, (batch, hidden), jnp.float32)
    layers = make_sequential_params(k_params, dims)

    module = CheckpointModule(layers, num_segments=1)
    fwd = jax.jit(lambda v: module(v))
    out = jax.block_until_ready(fwd(x))

    # Forward sanity: match plain-JAX reference of the same sequential.
    ref = x
    for w, b, _ in layers:
        ref = jnp.maximum(ref @ w + b, 0.0)
    assert out.shape == (batch, hidden)
    assert jnp.allclose(out, ref, atol=1e-4, rtol=1e-4)

    # Backward sanity: checkpointing + custom_vjp (no AD through pallas_call).
    loss = jax.jit(lambda v: jnp.sum(module(v) ** 2))
    g = jax.block_until_ready(jax.grad(loss)(x))

    def ref_fwd(v):
        r = v
        for w, b, _ in layers:
            r = jnp.maximum(r @ w + b, 0.0)
        return r

    g_ref = jax.grad(lambda v: jnp.sum(ref_fwd(v) ** 2))(x)
    assert g.shape == x.shape
    assert jnp.allclose(g, g_ref, atol=1e-3, rtol=1e-3)

    print("KERNEL_OK")
</pallas_src>

<mosaic_0001>
module attributes {stable_mosaic.version = 11 : i64} {
  func.func @_fused_mlp2_kernel(%arg0: i32, %arg1: memref<8x32xf32, #tpu.memory_space<vmem>>, %arg2: memref<32x64xf32, #tpu.memory_space<vmem>>, %arg3: memref<1x64xf32, #tpu.memory_space<vmem>>, %arg4: memref<64x32xf32, #tpu.memory_space<vmem>>, %arg5: memref<1x32xf32, #tpu.memory_space<vmem>>, %arg6: memref<8x32xf32, #tpu.memory_space<vmem>>) attributes {dimension_semantics = [#tpu.dimension_semantics<parallel>], iteration_bounds = array<i64: 1>, scalar_prefetch = 0 : i64, scratch_operands = 0 : i64, tpu.core_type = #tpu.core_type<tc>, window_params = [{transform_indices = @transform_0, window_bounds = array<i64: 8, 32>}, {pipeline_mode = #tpu.pipeline_mode<synchronous>, transform_indices = @transform_1, window_bounds = array<i64: 32, 64>}, {pipeline_mode = #tpu.pipeline_mode<synchronous>, transform_indices = @transform_2, window_bounds = array<i64: 1, 64>}, {pipeline_mode = #tpu.pipeline_mode<synchronous>, transform_indices = @transform_3, window_bounds = array<i64: 64, 32>}, {pipeline_mode = #tpu.pipeline_mode<synchronous>, transform_indices = @transform_4, window_bounds = array<i64: 1, 32>}, {transform_indices = @transform_5, window_bounds = array<i64: 8, 32>}]} {
    %c0 = arith.constant 0 : index
    %c0_0 = arith.constant 0 : index
    %0 = vector.load %arg1[%c0, %c0_0] : memref<8x32xf32, #tpu.memory_space<vmem>>, vector<8x32xf32>
    %c0_1 = arith.constant 0 : index
    %c0_2 = arith.constant 0 : index
    %1 = vector.load %arg2[%c0_1, %c0_2] : memref<32x64xf32, #tpu.memory_space<vmem>>, vector<32x64xf32>
    %cst = arith.constant dense<0.000000e+00> : vector<8x64xf32>
    %2 = tpu.matmul %0, %1, %cst {dimension_numbers = #tpu.dot_dimension_numbers<[1], [0], [0], [1], [0, 0, 1, 1], [], []>} : vector<8x32xf32>, vector<32x64xf32>, vector<8x64xf32> -> vector<8x64xf32>
    %c0_3 = arith.constant 0 : index
    %c0_4 = arith.constant 0 : index
    %3 = vector.load %arg3[%c0_3, %c0_4] : memref<1x64xf32, #tpu.memory_space<vmem>>, vector<1x64xf32>
    %4 = vector.broadcast %3 : vector<1x64xf32> to vector<8x64xf32>
    %5 = arith.addf %2, %4 : vector<8x64xf32>
    %cst_5 = arith.constant 0.000000e+00 : f32
    %6 = vector.broadcast %cst_5 : f32 to vector<8x64xf32>
    %7 = arith.maximumf %5, %6 : vector<8x64xf32>
    %c0_6 = arith.constant 0 : index
    %c0_7 = arith.constant 0 : index
    %8 = vector.load %arg4[%c0_6, %c0_7] : memref<64x32xf32, #tpu.memory_space<vmem>>, vector<64x32xf32>
    %cst_8 = arith.constant dense<0.000000e+00> : vector<8x32xf32>
    %9 = tpu.matmul %7, %8, %cst_8 {dimension_numbers = #tpu.dot_dimension_numbers<[1], [0], [0], [1], [0, 0, 1, 1], [], []>} : vector<8x64xf32>, vector<64x32xf32>, vector<8x32xf32> -> vector<8x32xf32>
    %c0_9 = arith.constant 0 : index
    %c0_10 = arith.constant 0 : index
    %10 = vector.load %arg5[%c0_9, %c0_10] : memref<1x32xf32, #tpu.memory_space<vmem>>, vector<1x32xf32>
    %11 = vector.broadcast %10 : vector<1x32xf32> to vector<8x32xf32>
    %12 = arith.addf %9, %11 : vector<8x32xf32>
    %cst_11 = arith.constant 0.000000e+00 : f32
    %13 = vector.broadcast %cst_11 : f32 to vector<8x32xf32>
    %14 = arith.maximumf %12, %13 : vector<8x32xf32>
    %c0_12 = arith.constant 0 : index
    %c0_13 = arith.constant 0 : index
    %15 = vector.load %arg6[%c0_12, %c0_13] : memref<8x32xf32, #tpu.memory_space<vmem>>, vector<8x32xf32>
    tpu.vector_store %arg6[%c0_12, %c0_13], %14 {strides = array<i32>} : memref<8x32xf32, #tpu.memory_space<vmem>>, vector<8x32xf32>,
    return
  }
  func.func @transform_0(%arg0: i32) -> (i32, i32) {
    %c0_i32 = arith.constant 0 : i32
    %c0_i32_0 = arith.constant 0 : i32
    return %arg0, %c0_i32 : i32, i32
  }
  func.func @transform_1(%arg0: i32) -> (i32, i32) {
    %c0_i32 = arith.constant 0 : i32
    %c0_i32_0 = arith.constant 0 : i32
    %c0_i32_1 = arith.constant 0 : i32
    return %c0_i32, %c0_i32_0 : i32, i32
  }
  func.func @transform_2(%arg0: i32) -> (i32, i32) {
    %c0_i32 = arith.constant 0 : i32
    %c0_i32_0 = arith.constant 0 : i32
    %c0_i32_1 = arith.constant 0 : i32
    return %c0_i32, %c0_i32_0 : i32, i32
  }
  func.func @transform_3(%arg0: i32) -> (i32, i32) {
    %c0_i32 = arith.constant 0 : i32
    %c0_i32_0 = arith.constant 0 : i32
    %c0_i32_1 = arith.constant 0 : i32
    return %c0_i32, %c0_i32_0 : i32, i32
  }
  func.func @transform_4(%arg0: i32) -> (i32, i32) {
    %c0_i32 = arith.constant 0 : i32
    %c0_i32_0 = arith.constant 0 : i32
    %c0_i32_1 = arith.constant 0 : i32
    return %c0_i32, %c0_i32_0 : i32, i32
  }
  func.func @transform_5(%arg0: i32) -> (i32, i32) {
    %c0_i32 = arith.constant 0 : i32
    %c0_i32_0 = arith.constant 0 : i32
    return %arg0, %c0_i32 : i32, i32
  }
}

</mosaic_0001>

<bundles_post_ra>
// kernel: checkpoint.1
= control target key start
LH: loop header
LB: loop body
LE: loop exit
PB: predicated region body
PF: predicated region fallthrough
CT: control target
= control target key end

     0   :  { %10 = vsyncpa [#allocation3], 0  ;;  %s454_s0 = inlined_call_operand.hbm [shape: f32[8,32], index: 0, kind: input, shape index: {}]   ;;  %s455_s1 = inlined_call_operand.hbm [shape: f32[32,64], index: 1, kind: input, shape index: {}]   ;;  %s456_s2 = inlined_call_operand.vmem [shape: f32[1,64], index: 2, kind: input, shape index: {}]   ;;  %s457_s3 = inlined_call_operand.hbm [shape: f32[64,32], index: 3, kind: input, shape index: {}]   ;;  %s458_s4 = inlined_call_operand.vmem [shape: f32[1,32], index: 4, kind: input, shape index: {}]   ;;  %s459_s5 = inlined_call_operand.hbm [shape: f32[8,32], index: 5, kind: output, shape index: {}]  }
   0x1   :  { %11 = vsyncpa [#allocation6], 0 }
   0x2   :  { %12 = vsyncpa [#allocation4], 0  ;;  %s396_s18 = smov [#allocation5]  }
   0x3   :  { %s28_s19 = sshll.u32 %s396_s18, 4  ;;  %s29_s19 = int_to_ptr.vmem [resolvable:$true] %s28_s19 }
   0x4   :  { %s318_s20 = scalar_lea.vmem %s29_s19, 512  ;;  %p323_p1 = scmp.lt.s32.totalorder %s29_s19, %s29_s19 }
   0x5   :  { %p319_p0 = scmp.ne.s32.totalorder %s29_s19, %s318_s20  ;;  %p324_p2 = scmp.lt.s32.totalorder %s318_s20, %s318_s20 }
   0x7   :  { %p325_p3 = por %p324_p2, %p323_p1 }
   0x9   :  { %p326_p4 = pnand %p325_p3, %p319_p0 }
   0xb   :  { %329 = shalt.err (!%p326_p4)
}
   0xc   :  { %s397_s21 = smov 128   ;;  %s398_s22 = smov 8  }
   0xd   :  { %34 = dma.hbm_to_vmem [thread:$0]  %s455_s1, 512, %s29_s19, [#allocation6], %s397_s21, %s397_s21, %s398_s22  }
   0xe   :  { %s399_s25 = smov [#allocation2]   ;;  %s400_s27 = smov [#allocation7]  }
   0xf   :  { %s19_s26 = sshll.u32 %s399_s25, 4  ;;  %s42_s28 = sshll.u32 %s400_s27, 4  ;;  %s20_s26 = int_to_ptr.vmem [resolvable:$true] %s19_s26  ;;  %s43_s28 = int_to_ptr.vmem [resolvable:$true] %s42_s28 }
  0x10   :  { %s338_s29 = scalar_lea.vmem %s20_s26, 128  ;;  %p343_p6 = scmp.lt.s32.totalorder %s20_s26, %s20_s26 }
  0x11   :  { %p339_p5 = scmp.ne.s32.totalorder %s20_s26, %s338_s29  ;;  %p344_p7 = scmp.lt.s32.totalorder %s338_s29, %s338_s29 }
  0x13   :  { %p345_p8 = por %p344_p7, %p343_p6 }
  0x15   :  { %p346_p9 = pnand %p345_p8, %p339_p5 }
  0x17   :  { %349 = shalt.err (!%p346_p9)
}
  0x18   :  { %22 = dma.hbm_to_vmem [thread:$0]  %s454_s0, 128, %s20_s26, [#allocation3]  }
  0x19   :  { %s358_s7 = scalar_lea.vmem %s43_s28, 1024  ;;  %p363_p11 = scmp.lt.s32.totalorder %s43_s28, %s43_s28 }
  0x1a   :  { %p359_p10 = scmp.ne.s32.totalorder %s43_s28, %s358_s7  ;;  %p364_p12 = scmp.lt.s32.totalorder %s358_s7, %s358_s7 }
  0x1c   :  { %p365_p13 = por %p364_p12, %p363_p11 }
  0x1e   :  { %p366_p0 = pnand %p365_p13, %p359_p10 }
  0x20   :  { %369 = shalt.err (!%p366_p0)
}
  0x21   :  { %48 = dma.hbm_to_vmem [thread:$0]  %s457_s3, 1024, %s43_s28, [#allocation6], %s397_s21, %s397_s21, %s398_s22  }
  0x22   :  { %390 = dma.done.wait [#allocation3], 128  }
  0x23   :  { %391 = vsyncadd [#allocation3], 4294967168 }
  0x24   :  { %392 = dma.done.wait [#allocation6], 1536  }
  0x25   :  { %393 = vsyncadd [#allocation6], 4294965760  ;;  %v401_v0 = vmov 0.0   ;;  %vm402_vm0 = vmmov 0   ;;  %v64_v1 = vld [vmem:[#allocation5 + $0x18] sm:$0xff]  ;;  %v63_v2 = vld [vmem:[#allocation5 + $0x10] sm:$0xff] }
  0x26   :  { %272 = vmatprep.subr.mxu0 %v401_v0  ;;  %280 = vmatprep.mubr.msk.f32.mxu0 %vm402_vm0, %v401_v0  ;;  %v154_v3 = vld [vmem:[#allocation7 + $0x38] sm:$0xff]  ;;  %v62_v4 = vld [vmem:[#allocation5 + $0x8] sm:$0xff]  ;;  %v153_v5 = vld [vmem:[#allocation7 + $0x30] sm:$0xff]  ;;  %vm72_vm1 = vcmask 261120   ;;  %vm162_vm2 = vcmask 523264   ;;  %s403_s11 = smov [#allocation8]  }
  0x27   :  { %283 = vmatprep.subr.mxu1 %v401_v0  ;;  %299 = vmatprep.mubr.msk.f32.mxu1 %vm402_vm0, %v401_v0  ;;  %v152_v6 = vld [vmem:[#allocation7 + $0x28] sm:$0xff]  ;;  %v61_v7 = vld [vmem:[#allocation5] sm:$0xff]  ;;  %v60_v8 = vld [vmem:[#allocation2] sm:$0xff]  ;;  %s244_s12 = sshll.u32 %s403_s11, 4  ;;  %s245_s12 = int_to_ptr.vmem [resolvable:$true] %s244_s12 }
  0x28   :  { %273 = vmatpush3.msra.mxu0 %v64_v1  ;;  %284 = vmatpush3.msra.mxu1 %v154_v3  ;;  %v151_v9 = vld [vmem:[#allocation7 + $0x20] sm:$0xff]  ;;  %v150_v10 = vld [vmem:[#allocation7 + $0x18] sm:$0xff]  ;;  %v149_v11 = vld [vmem:[#allocation7 + $0x10] sm:$0xff]  ;;  %p375_p2 = scmp.lt.s32.totalorder %s245_s12, %s245_s12 }
  0x29   :  { %274 = vmatprep.subr.mxu0 %v401_v0  ;;  %285 = vmatprep.subr.mxu1 %v401_v0  ;;  %v148_v12 = vld [vmem:[#allocation7 + $0x8] sm:$0xff]  ;;  %v147_v13 = vld [vmem:[#allocation7] sm:$0xff]  ;;  %v254_v14 = vld [vmem:[%s456_s2] ss:$0 sm:$0xff]  ;;  %s370_s2 = scalar_lea.vmem %s245_s12, 128 }
  0x2a   :  { %275 = vmatpush3.msra.mxu0 %v63_v2  ;;  %286 = vmatpush3.msra.mxu1 %v153_v5  ;;  %v256_v19 = vld [vmem:[%s458_s4] ss:$0 sm:$0xff]  ;;  %p371_p1 = scmp.ne.s32.totalorder %s245_s12, %s370_s2  ;;  %p376_p3 = scmp.lt.s32.totalorder %s370_s2, %s370_s2 }
  0x2b   :  { %276 = vmatprep.subr.mxu0 %v401_v0  ;;  %287 = vmatprep.subr.mxu1 %v401_v0 }
  0x2c   :  { %277 = vmatpush3.msra.mxu0 %v62_v4  ;;  %288 = vmatpush3.msra.mxu1 %v152_v6  ;;  %p377_p4 = por %p376_p3, %p375_p2 }
  0x2d   :  { %278 = vmatprep.subr.mxu0 %v401_v0  ;;  %289 = vmatprep.subr.mxu1 %v401_v0 }
  0x2e   :  { %279 = vmatpush3.msra.mxu0 %v61_v7  ;;  %290 = vmatpush3.msra.mxu1 %v151_v9  ;;  %p378_p5 = pnand %p377_p4, %p371_p1 }
  0x2f   :  { %281 = vmatmul.mubr.msk.f32.vlgmr.msra.gmra.mxu0 %vm72_vm1, %v60_v8  ;;  %291 = vmatprep.subr.mxu1 %v401_v0 }
  0x30   :  { %292 = vmatpush3.msra.mxu1 %v150_v10 }
  0x31   :  { %293 = vmatprep.subr.mxu1 %v401_v0 }
  0x32   :  { %294 = vmatpush3.msra.mxu1 %v149_v11 }
  0x33   :  { %295 = vmatprep.subr.mxu1 %v401_v0 }
  0x34   :  { %296 = vmatpush3.msra.mxu1 %v148_v12 }
  0x35   :  { %297 = vmatprep.subr.mxu1 %v401_v0 }
  0x36   :  { %298 = vmatpush3.msra.mxu1 %v147_v13 }
  0xef   :  { %v142_v15 = vpop.f32.mrf.mxu0 }
  0xf0   :  { %v143_v16 = vadd.f32 %v254_v14, %v142_v15 }
  0xf1   :  { %v282_v17 = vpop.f32.mrf.mxu0 }
  0xf2   :  { %v146_v18 = vmax.f32 %v143_v16, 0.0 }
  0xf4   :  { %300 = vmatmul.mubr.msk.f32.vlgmr.msra.gmra.mxu1 %vm162_vm2, %v146_v18 }
 0x1b4   :  { %v232_v20 = vpop.f32.mrf.mxu1 }
 0x1b5   :  { %v233_v21 = vadd.f32 %v256_v19, %v232_v20 }
 0x1b6   :  { %v301_v22 = vpop.f32.mrf.mxu1 }
 0x1b7   :  { %v236_v23 = vmax.f32 %v233_v21, 0.0 }
 0x1b9   :  { %237 = vst.msk [vmem:[#allocation8] sm:$0xff] %vm72_vm1, %v236_v23 }
 0x1ba   :  { %381 = shalt.err (!%p378_p5)
}
 0x1bb   :  { %247 = dma.vmem_to_hbm [thread:$0]  %s245_s12, 128, %s459_s5, [#allocation4]  }
 0x1bc   :  { %394 = dma.done.wait [#allocation4], 128  }
 0x1bd   :  { %395 = vsyncadd [#allocation4], 4294967168 }
 0x1be   :  { %251 = vsyncpa [#allocation3], 1 }
 0x1bf   :  { %252 = vsyncpa [#allocation6], 1 }
 0x1c0   :  { %253 = vsyncpa [#allocation4], 1 }

</bundles_post_ra>
